<compile_context>
chip_gen: v7x
topology: tpu7x:2x2x1
jax: 0.10.0
libtpu: 0.0.40
codegen_flags: <defaults>
</compile_context>

<pallas_src>
import functools

import jax
import jax.numpy as jnp
from jax.experimental import pallas as pl
from jax.experimental.pallas import tpu as pltpu

LANE = 128          # vreg lane width (last-dim tiling unit)
MIN_TILE_B = 16     # bf16 rows per packed sublane group
TILE_B_MAX = 1024   # max batch-tile rows (<< VMEM at 128-lane feature widths)


def _round_up(x, m):
    return ((x + m - 1) // m) * m


def _cdiv(a, b):
    return (a + b - 1) // b


def _batch_tiling(B):
    """Balanced batch tiles, multiples of 16 rows, each <= TILE_B_MAX.

    Keeps >=2 grid steps for moderate batches so the 'parallel' batch axis can
    shard across v7x's two TensorCores; avoids the old min(round_up(B,8),512)
    scheme that could pad B by up to ~2x.
    """
    n_tiles = _cdiv(B, TILE_B_MAX)
    if B >= 2 * MIN_TILE_B:
        n_tiles = max(n_tiles, 2)
    tile_b = _round_up(_cdiv(B, n_tiles), MIN_TILE_B)
    grid = _cdiv(B, tile_b)
    return tile_b, tile_b * grid, grid


def mlp_kernel(x_ref, w1_ref, b1_ref, w2_ref, b2_ref, w3_ref, b3_ref, out_ref):
    # Layer 1: bf16 matmul on the MXU, f32 accumulate; bias + ReLU in f32 (VPU).
    h = jnp.dot(x_ref[...], w1_ref[...], preferred_element_type=jnp.float32)
    h = jnp.maximum(h + b1_ref[...], 0.0)
    # Layer 2.
    h = jnp.dot(h.astype(jnp.bfloat16), w2_ref[...],
                preferred_element_type=jnp.float32)
    h = jnp.maximum(h + b2_ref[...], 0.0)
    # Output layer (identity out activation).
    o = jnp.dot(h.astype(jnp.bfloat16), w3_ref[...],
                preferred_element_type=jnp.float32)
    out_ref[...] = (o + b3_ref[...]).astype(out_ref.dtype)


def prepare_params(params):
    """Pad feature dims to 128 lanes and cast weights to bf16 ONCE (hoisted
    out of the per-call path).  Zero padding is exact for Linear + ReLU."""
    w1, b1 = params["w1"], params["b1"]
    w2, b2 = params["w2"], params["b2"]
    w3, b3 = params["w3"], params["b3"]
    in_dim, h1 = w1.shape
    h2 = w2.shape[1]
    act_dim = w3.shape[1]
    in_p, h1_p, h2_p, act_p = (_round_up(d, LANE)
                               for d in (in_dim, h1, h2, act_dim))
    padded = dict(
        w1=jnp.pad(w1, ((0, in_p - in_dim), (0, h1_p - h1))).astype(jnp.bfloat16),
        b1=jnp.pad(b1, ((0, 0), (0, h1_p - h1))).astype(jnp.float32),
        w2=jnp.pad(w2, ((0, h1_p - h1), (0, h2_p - h2))).astype(jnp.bfloat16),
        b2=jnp.pad(b2, ((0, 0), (0, h2_p - h2))).astype(jnp.float32),
        w3=jnp.pad(w3, ((0, h2_p - h2), (0, act_p - act_dim))).astype(jnp.bfloat16),
        b3=jnp.pad(b3, ((0, 0), (0, act_p - act_dim))).astype(jnp.float32),
    )
    return padded, (in_dim, h1, h2, act_dim)


def make_policy_forward(params):
    """Returns a jitted `state [B, input_dim] f32 -> [B, action_dim] f32`."""
    padded, (in_dim, h1, h2, act_dim) = prepare_params(params)
    in_p, h1_p = padded["w1"].shape
    h2_p = padded["w2"].shape[1]
    act_p = padded["w3"].shape[1]

    @jax.jit
    def forward(state, p):
        B = state.shape[0]
        tile_b, b_p, grid = _batch_tiling(B)
        # Only the streamed activation is padded/cast inside the jitted path.
        x_p = jnp.pad(state,
                      ((0, b_p - B), (0, in_p - in_dim))).astype(jnp.bfloat16)

        # Batch-tiled, auto double-buffered activation stream.
        batch_spec = lambda cols: pl.BlockSpec((tile_b, cols), lambda i: (i, 0))
        # Weights/biases: constant index_map -> DMA'd once, VMEM-resident.
        # (Use pipeline_mode=pl.Buffered(1) here if hidden dims reach MiB scale.)
        resident = lambda shape: pl.BlockSpec(shape, lambda i: (0, 0))

        # Scheduling hint from TRUE (unpadded) dims.
        flops = 2 * B * (in_dim * h1 + h1 * h2 + h2 * act_dim)
        bytes_accessed = (
            B * in_dim * 2
            + (in_dim * h1 + h1 * h2 + h2 * act_dim) * 2
            + (h1 + h2 + act_dim) * 4
            + B * act_dim * 4)

        out_p = pl.pallas_call(
            mlp_kernel,
            out_shape=jax.ShapeDtypeStruct((b_p, act_p), jnp.float32),
            grid=(grid,),
            in_specs=[
                batch_spec(in_p),                                # state tile
                resident((in_p, h1_p)), resident((1, h1_p)),     # W1, b1
                resident((h1_p, h2_p)), resident((1, h2_p)),     # W2, b2
                resident((h2_p, act_p)), resident((1, act_p)),   # W3, b3
            ],
            out_specs=batch_spec(act_p),
            compiler_params=pltpu.CompilerParams(
                dimension_semantics=("parallel",)),
            cost_estimate=pl.CostEstimate(
                flops=flops, transcendentals=0, bytes_accessed=bytes_accessed),
        )(x_p, p["w1"], p["b1"], p["w2"], p["b2"], p["w3"], p["b3"])

        # TODO(synk): for large-batch inference, store bf16 in-kernel and
        # upcast after the slice to halve the padded-output HBM writeback.
        return out_p[:B, :act_dim]

    return functools.partial(forward, p=padded)


def make_params(key, input_dim, hidden_dims, action_dim):
    """Deterministic synthetic parameters (PyTorch Linear init), stored as
    [in, out] so the kernel computes x @ W + b directly."""
    dims = [input_dim] + list(hidden_dims) + [action_dim]
    keys = jax.random.split(key, 2 * (len(dims) - 1))
    params = {}
    for i in range(len(dims) - 1):
        fan_in, fan_out = dims[i], dims[i + 1]
        bound = 1.0 / jnp.sqrt(fan_in)
        params[f"w{i+1}"] = jax.random.uniform(
            keys[2 * i], (fan_in, fan_out), jnp.float32, -bound, bound)
        params[f"b{i+1}"] = jax.random.uniform(
            keys[2 * i + 1], (1, fan_out), jnp.float32, -bound, bound)
    return params


def reference_forward_bf16(state, params):
    """Same bf16-matmul / f32-accumulate math as the kernel, in plain JAX."""
    bf = jnp.bfloat16
    h = jnp.dot(state.astype(bf), params["w1"].astype(bf),
                preferred_element_type=jnp.float32) + params["b1"]
    h = jnp.maximum(h, 0.0)
    h = jnp.dot(h.astype(bf), params["w2"].astype(bf),
                preferred_element_type=jnp.float32) + params["b2"]
    h = jnp.maximum(h, 0.0)
    return jnp.dot(h.astype(bf), params["w3"].astype(bf),
                   preferred_element_type=jnp.float32) + params["b3"]


def reference_forward_f32(state, params):
    h = jnp.maximum(state @ params["w1"] + params["b1"], 0.0)
    h = jnp.maximum(h @ params["w2"] + params["b2"], 0.0)
    return h @ params["w3"] + params["b3"]


if __name__ == "__main__":
    key = jax.random.PRNGKey(0)
    k_param, k_state = jax.random.split(key)

    input_dim = 16        # observation dim
    hidden_dims = [32, 32]
    action_dim = 4        # Box action space of dim 4
    batch = 8

    params = make_params(k_param, input_dim, hidden_dims, action_dim)
    state = jax.random.normal(k_state, (batch, input_dim), jnp.float32)

    policy_forward = make_policy_forward(params)   # pads/casts weights ONCE
    out = jax.block_until_ready(policy_forward(state))

    assert out.shape == (batch, action_dim)
    ref_bf16 = reference_forward_bf16(state, params)
    ref_f32 = reference_forward_f32(state, params)
    assert jnp.allclose(out, ref_bf16, atol=1e-4, rtol=1e-4), "mismatch vs bf16 ref"
    assert jnp.allclose(out, ref_f32, atol=5e-2, rtol=5e-2), "mismatch vs f32 ref"

    print("KERNEL_OK")
</pallas_src>

<mosaic_0001>
module attributes {stable_mosaic.version = 11 : i64} {
  func.func @mlp_kernel(%arg0: i32, %arg1: memref<16x128xbf16, #tpu.memory_space<vmem>>, %arg2: memref<128x128xbf16, #tpu.memory_space<vmem>>, %arg3: memref<1x128xf32, #tpu.memory_space<vmem>>, %arg4: memref<128x128xbf16, #tpu.memory_space<vmem>>, %arg5: memref<1x128xf32, #tpu.memory_space<vmem>>, %arg6: memref<128x128xbf16, #tpu.memory_space<vmem>>, %arg7: memref<1x128xf32, #tpu.memory_space<vmem>>, %arg8: memref<16x128xf32, #tpu.memory_space<vmem>>) attributes {dimension_semantics = [#tpu.dimension_semantics<parallel>], iteration_bounds = array<i64: 1>, scalar_prefetch = 0 : i64, scratch_operands = 0 : i64, tpu.core_type = #tpu.core_type<tc>, window_params = [{transform_indices = @transform_0, window_bounds = array<i64: 16, 128>}, {pipeline_mode = #tpu.pipeline_mode<synchronous>, transform_indices = @transform_1, window_bounds = array<i64: 128, 128>}, {pipeline_mode = #tpu.pipeline_mode<synchronous>, transform_indices = @transform_2, window_bounds = array<i64: 1, 128>}, {pipeline_mode = #tpu.pipeline_mode<synchronous>, transform_indices = @transform_3, window_bounds = array<i64: 128, 128>}, {pipeline_mode = #tpu.pipeline_mode<synchronous>, transform_indices = @transform_4, window_bounds = array<i64: 1, 128>}, {pipeline_mode = #tpu.pipeline_mode<synchronous>, transform_indices = @transform_5, window_bounds = array<i64: 128, 128>}, {pipeline_mode = #tpu.pipeline_mode<synchronous>, transform_indices = @transform_6, window_bounds = array<i64: 1, 128>}, {transform_indices = @transform_7, window_bounds = array<i64: 16, 128>}]} {
    %c0 = arith.constant 0 : index
    %c0_0 = arith.constant 0 : index
    %0 = vector.load %arg1[%c0, %c0_0] : memref<16x128xbf16, #tpu.memory_space<vmem>>, vector<16x128xbf16>
    %c0_1 = arith.constant 0 : index
    %c0_2 = arith.constant 0 : index
    %1 = vector.load %arg2[%c0_1, %c0_2] : memref<128x128xbf16, #tpu.memory_space<vmem>>, vector<128x128xbf16>
    %cst = arith.constant dense<0.000000e+00> : vector<16x128xf32>
    %2 = tpu.matmul %0, %1, %cst {dimension_numbers = #tpu.dot_dimension_numbers<[1], [0], [0], [1], [0, 0, 1, 1], [], []>} : vector<16x128xbf16>, vector<128x128xbf16>, vector<16x128xf32> -> vector<16x128xf32>
    %c0_3 = arith.constant 0 : index
    %c0_4 = arith.constant 0 : index
    %3 = vector.load %arg3[%c0_3, %c0_4] : memref<1x128xf32, #tpu.memory_space<vmem>>, vector<1x128xf32>
    %4 = vector.broadcast %3 : vector<1x128xf32> to vector<16x128xf32>
    %5 = arith.addf %2, %4 : vector<16x128xf32>
    %cst_5 = arith.constant 0.000000e+00 : f32
    %6 = vector.broadcast %cst_5 : f32 to vector<16x128xf32>
    %7 = arith.maximumf %5, %6 : vector<16x128xf32>
    %8 = arith.truncf %7 : vector<16x128xf32> to vector<16x128xbf16>
    %c0_6 = arith.constant 0 : index
    %c0_7 = arith.constant 0 : index
    %9 = vector.load %arg4[%c0_6, %c0_7] : memref<128x128xbf16, #tpu.memory_space<vmem>>, vector<128x128xbf16>
    %cst_8 = arith.constant dense<0.000000e+00> : vector<16x128xf32>
    %10 = tpu.matmul %8, %9, %cst_8 {dimension_numbers = #tpu.dot_dimension_numbers<[1], [0], [0], [1], [0, 0, 1, 1], [], []>} : vector<16x128xbf16>, vector<128x128xbf16>, vector<16x128xf32> -> vector<16x128xf32>
    %c0_9 = arith.constant 0 : index
    %c0_10 = arith.constant 0 : index
    %11 = vector.load %arg5[%c0_9, %c0_10] : memref<1x128xf32, #tpu.memory_space<vmem>>, vector<1x128xf32>
    %12 = vector.broadcast %11 : vector<1x128xf32> to vector<16x128xf32>
    %13 = arith.addf %10, %12 : vector<16x128xf32>
    %cst_11 = arith.constant 0.000000e+00 : f32
    %14 = vector.broadcast %cst_11 : f32 to vector<16x128xf32>
    %15 = arith.maximumf %13, %14 : vector<16x128xf32>
    %16 = arith.truncf %15 : vector<16x128xf32> to vector<16x128xbf16>
    %c0_12 = arith.constant 0 : index
    %c0_13 = arith.constant 0 : index
    %17 = vector.load %arg6[%c0_12, %c0_13] : memref<128x128xbf16, #tpu.memory_space<vmem>>, vector<128x128xbf16>
    %cst_14 = arith.constant dense<0.000000e+00> : vector<16x128xf32>
    %18 = tpu.matmul %16, %17, %cst_14 {dimension_numbers = #tpu.dot_dimension_numbers<[1], [0], [0], [1], [0, 0, 1, 1], [], []>} : vector<16x128xbf16>, vector<128x128xbf16>, vector<16x128xf32> -> vector<16x128xf32>
    %c0_15 = arith.constant 0 : index
    %c0_16 = arith.constant 0 : index
    %19 = vector.load %arg7[%c0_15, %c0_16] : memref<1x128xf32, #tpu.memory_space<vmem>>, vector<1x128xf32>
    %20 = vector.broadcast %19 : vector<1x128xf32> to vector<16x128xf32>
    %21 = arith.addf %18, %20 : vector<16x128xf32>
    %c0_17 = arith.constant 0 : index
    %c0_18 = arith.constant 0 : index
    %22 = vector.load %arg8[%c0_17, %c0_18] : memref<16x128xf32, #tpu.memory_space<vmem>>, vector<16x128xf32>
    tpu.vector_store %arg8[%c0_17, %c0_18], %21 {strides = array<i32>} : memref<16x128xf32, #tpu.memory_space<vmem>>, vector<16x128xf32>,
    return
  }
  func.func @transform_0(%arg0: i32) -> (i32, i32) {
    %c0_i32 = arith.constant 0 : i32
    %c0_i32_0 = arith.constant 0 : i32
    return %arg0, %c0_i32 : i32, i32
  }
  func.func @transform_1(%arg0: i32) -> (i32, i32) {
    %c0_i32 = arith.constant 0 : i32
    %c0_i32_0 = arith.constant 0 : i32
    %c0_i32_1 = arith.constant 0 : i32
    return %c0_i32, %c0_i32_0 : i32, i32
  }
  func.func @transform_2(%arg0: i32) -> (i32, i32) {
    %c0_i32 = arith.constant 0 : i32
    %c0_i32_0 = arith.constant 0 : i32
    %c0_i32_1 = arith.constant 0 : i32
    return %c0_i32, %c0_i32_0 : i32, i32
  }
  func.func @transform_3(%arg0: i32) -> (i32, i32) {
    %c0_i32 = arith.constant 0 : i32
    %c0_i32_0 = arith.constant 0 : i32
    %c0_i32_1 = arith.constant 0 : i32
    return %c0_i32, %c0_i32_0 : i32, i32
  }
  func.func @transform_4(%arg0: i32) -> (i32, i32) {
    %c0_i32 = arith.constant 0 : i32
    %c0_i32_0 = arith.constant 0 : i32
    %c0_i32_1 = arith.constant 0 : i32
    return %c0_i32, %c0_i32_0 : i32, i32
  }
  func.func @transform_5(%arg0: i32) -> (i32, i32) {
    %c0_i32 = arith.constant 0 : i32
    %c0_i32_0 = arith.constant 0 : i32
    %c0_i32_1 = arith.constant 0 : i32
    return %c0_i32, %c0_i32_0 : i32, i32
  }
  func.func @transform_6(%arg0: i32) -> (i32, i32) {
    %c0_i32 = arith.constant 0 : i32
    %c0_i32_0 = arith.constant 0 : i32
    %c0_i32_1 = arith.constant 0 : i32
    return %c0_i32, %c0_i32_0 : i32, i32
  }
  func.func @transform_7(%arg0: i32) -> (i32, i32) {
    %c0_i32 = arith.constant 0 : i32
    %c0_i32_0 = arith.constant 0 : i32
    return %arg0, %c0_i32 : i32, i32
  }
}

</mosaic_0001>

<bundles_post_ra>
// kernel: forward.1
= control target key start
LH: loop header
LB: loop body
LE: loop exit
PB: predicated region body
PF: predicated region fallthrough
CT: control target
= control target key end

     0   :  { %12 = vsyncpa [#allocation3], 0  ;;  %s790_s0 = inlined_call_operand.vmem [shape: bf16[16,128], index: 0, kind: input, shape index: {}]   ;;  %s791_s1 = inlined_call_operand.hbm [shape: bf16[128,128], index: 1, kind: input, shape index: {}]   ;;  %s792_s2 = inlined_call_operand.vmem [shape: f32[1,128], index: 2, kind: input, shape index: {}]   ;;  %s793_s3 = inlined_call_operand.hbm [shape: bf16[128,128], index: 3, kind: input, shape index: {}]   ;;  %s794_s4 = inlined_call_operand.vmem [shape: f32[1,128], index: 4, kind: input, shape index: {}]   ;;  %s795_s5 = inlined_call_operand.hbm [shape: bf16[128,128], index: 5, kind: input, shape index: {}]   ;;  %s796_s6 = inlined_call_operand.vmem [shape: f32[1,128], index: 6, kind: input, shape index: {}]   ;;  %s797_s7 = inlined_call_operand.vmem [shape: f32[16,128], index: 7, kind: output, shape index: {}]  }
   0x1   :  { %13 = vsyncpa [#allocation5], 0  ;;  %s643_s24 = smov [#allocation4]   ;;  %s644_s26 = smov [#allocation2]  }
   0x2   :  { %s35_s25 = sshll.u32 %s643_s24, 4  ;;  %s21_s27 = sshll.u32 %s644_s26, 4  ;;  %s36_s25 = int_to_ptr.vmem [resolvable:$true] %s35_s25  ;;  %s690_s27 = int_to_ptr.vmem [resolvable:$true] %s21_s27 }
   0x3   :  { %s573_s30 = scalar_lea.hbm %s793_s3, 1024 }
   0x4   :  { %p574_p0 = scmp.ne.s32.totalorder %s793_s3, %s573_s30  ;;  %p577_p1 = scmp.lt.u32.totalorder %s573_s30, %s793_s3 }
   0x6   :  { %p579_p2 = pnand %p577_p1, %p574_p0 }
   0x8   :  { %582 = shalt.err (!%p579_p2)
}
   0x9   :  { %s583_s12 = scalar_lea.vmem %s36_s25, 1024  ;;  %p588_p4 = scmp.lt.s32.totalorder %s36_s25, %s36_s25 }
   0xa   :  { %p584_p3 = scmp.ne.s32.totalorder %s36_s25, %s583_s12  ;;  %p589_p5 = scmp.lt.s32.totalorder %s583_s12, %s583_s12 }
   0xc   :  { %p590_p6 = por %p589_p5, %p588_p4 }
   0xe   :  { %p591_p7 = pnand %p590_p6, %p584_p3 }
  0x10   :  { %594 = shalt.err (!%p591_p7)
}
  0x11   :  { %s645_s13 = smov 64   ;;  %s646_s14 = smov 4  }
  0x12   :  { %41 = dma.hbm_to_vmem [thread:$0]  %s793_s3, 1024, %s36_s25, [#allocation5], %s645_s13, %s645_s13, %s646_s14  }
  0x13   :  { %s595_s19 = scalar_lea.hbm %s791_s1, 1024 }
  0x14   :  { %p596_p8 = scmp.ne.s32.totalorder %s791_s1, %s595_s19  ;;  %p599_p9 = scmp.lt.u32.totalorder %s595_s19, %s791_s1 }
  0x16   :  { %p601_p10 = pnand %p599_p9, %p596_p8 }
  0x18   :  { %604 = shalt.err (!%p601_p10)
}
  0x19   :  { %s605_s24 = scalar_lea.vmem %s690_s27, 1024  ;;  %p610_p12 = scmp.lt.s32.totalorder %s690_s27, %s690_s27 }
  0x1a   :  { %p606_p11 = scmp.ne.s32.totalorder %s690_s27, %s605_s24  ;;  %p611_p13 = scmp.lt.s32.totalorder %s605_s24, %s605_s24 }
  0x1c   :  { %p612_p0 = por %p611_p13, %p610_p12 }
  0x1e   :  { %p613_p1 = pnand %p612_p0, %p606_p11 }
  0x20   :  { %616 = shalt.err (!%p613_p1)
}
  0x21   :  { %27 = dma.hbm_to_vmem [thread:$0]  %s791_s1, 1024, %s690_s27, [#allocation3], %s645_s13, %s645_s13, %s646_s14  }
  0x22   :  { %s647_s26 = smov [#allocation6]   ;;  %s617_s8 = scalar_lea.hbm %s795_s5, 1024 }
  0x23   :  { %s49_s28 = sshll.u32 %s647_s26, 4  ;;  %p618_p2 = scmp.ne.s32.totalorder %s795_s5, %s617_s8  ;;  %s50_s28 = int_to_ptr.vmem [resolvable:$true] %s49_s28 }
  0x24   :  { %p621_p3 = scmp.lt.u32.totalorder %s617_s8, %s795_s5 }
  0x26   :  { %p623_p4 = pnand %p621_p3, %p618_p2 }
  0x28   :  { %626 = shalt.err (!%p623_p4)
}
  0x29   :  { %s627_s15 = scalar_lea.vmem %s50_s28, 1024  ;;  %p632_p6 = scmp.lt.s32.totalorder %s50_s28, %s50_s28 }
  0x2a   :  { %p628_p5 = scmp.ne.s32.totalorder %s50_s28, %s627_s15  ;;  %p633_p7 = scmp.lt.s32.totalorder %s627_s15, %s627_s15 }
  0x2c   :  { %p634_p8 = por %p633_p7, %p632_p6 }
  0x2e   :  { %p635_p9 = pnand %p634_p8, %p628_p5 }
  0x30   :  { %638 = shalt.err (!%p635_p9)
}
  0x31   :  { %55 = dma.hbm_to_vmem [thread:$0]  %s795_s5, 1024, %s50_s28, [#allocation5], %s645_s13, %s645_s13, %s646_s14  }
  0x32   :  { %639 = dma.done.wait [#allocation3], 1024  }
  0x33   :  { %640 = vsyncadd [#allocation3], 4294966272 }
  0x34   :  { %641 = dma.done.wait [#allocation5], 2048  }
  0x35   :  { %642 = vsyncadd [#allocation5], 4294965248  ;;  %v648_v0 = vmov 0.0   ;;  %vm649_vm0 = vmmov 0   ;;  %v548_v1 = vld [vmem:[#allocation2] sm:$0xff]   ;;  %v549_v2 = vld [vmem:[#allocation2 + $0x8] sm:$0xff]  }
  0x36   :  { %481 = vmatprep.subr.bf16.mxu0 %v648_v0  ;;  %497 = vmatprep.mubr.msk.bf16.mxu0 %vm649_vm0, %v648_v0  ;;  %v550_v3 = vld [vmem:[#allocation2 + $0x10] sm:$0xff]   ;;  %v557_v4 = vld [vmem:[#allocation4] sm:$0xff]   ;;  %v551_v5 = vld [vmem:[#allocation2 + $0x18] sm:$0xff]  }
  0x37   :  { %501 = vmatprep.subr.bf16.mxu1 %v648_v0  ;;  %517 = vmatprep.mubr.msk.bf16.mxu1 %vm649_vm0, %v648_v0  ;;  %v558_v6 = vld [vmem:[#allocation4 + $0x8] sm:$0xff]   ;;  %v552_v7 = vld [vmem:[#allocation2 + $0x20] sm:$0xff]   ;;  %v559_v8 = vld [vmem:[#allocation4 + $0x10] sm:$0xff]  }
  0x38   :  { %482 = vmatpush3.bf16.msra.mxu0 %v548_v1  ;;  %502 = vmatpush3.bf16.msra.mxu1 %v557_v4  ;;  %v553_v9 = vld [vmem:[#allocation2 + $0x28] sm:$0xff]   ;;  %v560_v10 = vld [vmem:[#allocation4 + $0x18] sm:$0xff]   ;;  %v554_v11 = vld [vmem:[#allocation2 + $0x30] sm:$0xff]  }
  0x39   :  { %483 = vmatprep.subr.bf16.mxu0 %v648_v0  ;;  %503 = vmatprep.subr.bf16.mxu1 %v648_v0  ;;  %v561_v12 = vld [vmem:[#allocation4 + $0x20] sm:$0xff]   ;;  %v555_v13 = vld [vmem:[#allocation2 + $0x38] sm:$0xff]   ;;  %v562_v14 = vld [vmem:[#allocation4 + $0x28] sm:$0xff]  }
  0x3a   :  { %v556_v15 = vld [vmem:[%s790_s0] sm:$0xff]   ;;  %v563_v16 = vld [vmem:[#allocation4 + $0x30] sm:$0xff]   ;;  %v564_v17 = vld [vmem:[#allocation4 + $0x38] sm:$0xff]  }
  0x3b   :  { %v565_v18 = vld [vmem:[#allocation6] sm:$0xff]   ;;  %v566_v19 = vld [vmem:[#allocation6 + $0x8] sm:$0xff]   ;;  %v567_v20 = vld [vmem:[#allocation6 + $0x10] sm:$0xff]  }
  0x3c   :  { %484 = vmatpush3.bf16.msra.mxu0 %v549_v2  ;;  %504 = vmatpush3.bf16.msra.mxu1 %v558_v6  ;;  %v568_v21 = vld [vmem:[#allocation6 + $0x18] sm:$0xff]   ;;  %v569_v22 = vld [vmem:[#allocation6 + $0x20] sm:$0xff]   ;;  %v570_v23 = vld [vmem:[#allocation6 + $0x28] sm:$0xff]  }
  0x3d   :  { %485 = vmatprep.subr.bf16.mxu0 %v648_v0  ;;  %505 = vmatprep.subr.bf16.mxu1 %v648_v0  ;;  %v426_v24 = vld [vmem:[%s792_s2] ss:$0 sm:$0xff]  ;;  %v571_v34 = vld [vmem:[#allocation6 + $0x30] sm:$0xff]   ;;  %v572_v35 = vld [vmem:[#allocation6 + $0x38] sm:$0xff]  }
  0x3e   :  { %v436_v36 = vld [vmem:[%s794_s4] ss:$0 sm:$0xff] }
  0x3f   :  { %v445_v46 = vld [vmem:[%s796_s6] ss:$0 sm:$0xff] }
  0x40   :  { %486 = vmatpush3.bf16.msra.mxu0 %v550_v3  ;;  %506 = vmatpush3.bf16.msra.mxu1 %v559_v8 }
  0x41   :  { %487 = vmatprep.subr.bf16.mxu0 %v648_v0  ;;  %507 = vmatprep.subr.bf16.mxu1 %v648_v0 }
  0x44   :  { %488 = vmatpush3.bf16.msra.mxu0 %v551_v5  ;;  %508 = vmatpush3.bf16.msra.mxu1 %v560_v10 }
  0x45   :  { %489 = vmatprep.subr.bf16.mxu0 %v648_v0  ;;  %509 = vmatprep.subr.bf16.mxu1 %v648_v0 }
  0x48   :  { %490 = vmatpush3.bf16.msra.mxu0 %v552_v7  ;;  %510 = vmatpush3.bf16.msra.mxu1 %v561_v12 }
  0x49   :  { %491 = vmatprep.subr.bf16.mxu0 %v648_v0  ;;  %511 = vmatprep.subr.bf16.mxu1 %v648_v0 }
  0x4c   :  { %492 = vmatpush3.bf16.msra.mxu0 %v553_v9  ;;  %512 = vmatpush3.bf16.msra.mxu1 %v562_v14 }
  0x4d   :  { %493 = vmatprep.subr.bf16.mxu0 %v648_v0  ;;  %513 = vmatprep.subr.bf16.mxu1 %v648_v0 }
  0x50   :  { %494 = vmatpush3.bf16.msra.mxu0 %v554_v11  ;;  %514 = vmatpush3.bf16.msra.mxu1 %v563_v16 }
  0x51   :  { %495 = vmatprep.subr.bf16.mxu0 %v648_v0  ;;  %515 = vmatprep.subr.bf16.mxu1 %v648_v0 }
  0x54   :  { %496 = vmatpush3.bf16.msra.mxu0 %v555_v13  ;;  %516 = vmatpush3.bf16.msra.mxu1 %v564_v17 }
  0x55   :  { %521 = vmatprep.subr.bf16.mxu0 %v648_v0 }
  0x57   :  { %498 = vmatmul.mubr.bf16.vlgmr.msra.gmra.mrb[0].mxu0 %v556_v15 }
  0x58   :  { %537 = vmatprep.mubr.msk.bf16.mxu0 %vm649_vm0, %v648_v0  ;;  %522 = vmatpush3.bf16.msra.mxu0 %v565_v18 }
  0x59   :  { %523 = vmatprep.subr.bf16.mxu0 %v648_v0 }
  0x5c   :  { %524 = vmatpush3.bf16.msra.mxu0 %v566_v19 }
  0x5d   :  { %525 = vmatprep.subr.bf16.mxu0 %v648_v0 }
  0x60   :  { %526 = vmatpush3.bf16.msra.mxu0 %v567_v20 }
  0x61   :  { %527 = vmatprep.subr.bf16.mxu0 %v648_v0 }
  0x64   :  { %528 = vmatpush3.bf16.msra.mxu0 %v568_v21 }
  0x65   :  { %529 = vmatprep.subr.bf16.mxu0 %v648_v0 }
  0x68   :  { %530 = vmatpush3.bf16.msra.mxu0 %v569_v22 }
  0x69   :  { %531 = vmatprep.subr.bf16.mxu0 %v648_v0 }
  0x6c   :  { %532 = vmatpush3.bf16.msra.mxu0 %v570_v23 }
  0x6d   :  { %533 = vmatprep.subr.bf16.mxu0 %v648_v0 }
  0x70   :  { %534 = vmatpush3.bf16.msra.mxu0 %v571_v34 }
  0x71   :  { %535 = vmatprep.subr.bf16.mxu0 %v648_v0 }
  0x74   :  { %536 = vmatpush3.bf16.msra.mxu0 %v572_v35 }
 0x12a   :  { %v181_v25 = vpop.f32.mrb[0].mxu0 }
 0x12b   :  { %v182_v26 = vadd.f32 %v426_v24, %v181_v25  ;;  %v499_v27 = vpop.f32.mrb[1].mxu0 }
 0x12c   :  { %v184_v28 = vpop.f32.mrb[2].mxu0 }
 0x12d   :  { %v185_v29 = vadd.f32 %v426_v24, %v184_v28  ;;  %v500_v30 = vpop.f32.mrb[3].mxu0  ;;  %v188_v31 = vmax.f32 %v182_v26, 0.0 }
 0x12f   :  { %v189_v32 = vmax.f32 %v185_v29, 0.0 }
 0x131   :  { %v190_v33 = vpack.c.bf16 %v189_v32, %v188_v31 }
 0x133   :  { %518 = vmatmul.mubr.bf16.vlgmr.msra.gmra.mrb[0].mxu1 %v190_v33 }
 0x206   :  { %v296_v37 = vpop.f32.mrb[0].mxu1 }
 0x207   :  { %v297_v38 = vadd.f32 %v436_v36, %v296_v37  ;;  %v519_v39 = vpop.f32.mrb[1].mxu1 }
 0x208   :  { %v299_v40 = vpop.f32.mrb[2].mxu1 }
 0x209   :  { %v300_v41 = vadd.f32 %v436_v36, %v299_v40  ;;  %v520_v42 = vpop.f32.mrb[3].mxu1  ;;  %v303_v43 = vmax.f32 %v297_v38, 0.0 }
 0x20b   :  { %v304_v44 = vmax.f32 %v300_v41, 0.0 }
 0x20d   :  { %v305_v45 = vpack.c.bf16 %v304_v44, %v303_v43 }
 0x20f   :  { %538 = vmatmul.mubr.bf16.vlgmr.msra.gmra.mrb[4].mxu0 %v305_v45 }
 0x2e2   :  { %v411_v47 = vpop.f32.mrb[4].mxu0 }
 0x2e3   :  { %v412_v48 = vadd.f32 %v445_v46, %v411_v47  ;;  %v539_v49 = vpop.f32.mrb[5].mxu0 }
 0x2e4   :  { %v414_v50 = vpop.f32.mrb[6].mxu0 }
 0x2e5   :  { %418 = vst [vmem:[%s797_s7] sm:$0xff] %v412_v48  ;;  %v415_v51 = vadd.f32 %v445_v46, %v414_v50  ;;  %v540_v52 = vpop.f32.mrb[7].mxu0 }
 0x2e7   :  { %419 = vst [vmem:[%s797_s7 + $0x8] sm:$0xff] %v415_v51 }
 0x2e8   :  { %424 = vsyncpa [#allocation3], 1 }
 0x2e9   :  { %425 = vsyncpa [#allocation5], 1 }

</bundles_post_ra>
